<compile_context>
chip_gen: v7x
topology: tpu7x:2x2x1
jax: 0.10.0
libtpu: 0.0.40
codegen_flags: <defaults>
</compile_context>

<pallas_src>
import functools

import jax
import jax.numpy as jnp
from jax.experimental import pallas as pl
from jax.experimental.pallas import tpu as pltpu


_LANES = 512                       # lane-dense slab width (multiple of 128)
_MIB = 1024 * 1024
_DEFAULT_VMEM_CAP = 64 * _MIB      # conservative fallback (v7x-sized)


def _cdiv(a: int, b: int) -> int:
    return -(-a // b)


def _round_up(x: int, m: int) -> int:
    return _cdiv(x, m) * m


def _sublane_multiple(dtype) -> int:
    itemsize = jnp.dtype(dtype).itemsize
    if itemsize >= 4:
        return 8
    if itemsize == 2:
        return 16
    return 32


@functools.lru_cache(maxsize=1)
def _vmem_capacity_bytes() -> int:
    try:
        return int(pltpu.get_tpu_info().vmem_capacity_bytes)
    except Exception:
        return _DEFAULT_VMEM_CAP


def _max_block_bytes() -> int:
    # ~8 MiB per buffer => 4 double-buffered slabs = 32 MiB; fits v7x's 64 MiB
    # VMEM with headroom and is well under v5e/v6e's 128 MiB.
    cap = _vmem_capacity_bytes()
    return 8 * _MIB if cap >= 64 * _MIB else max(2 * _MIB, cap // 8)


def _vmem_limit_bytes() -> int:
    cap = _vmem_capacity_bytes()
    return min(64 * _MIB, max(32 * _MIB, (cap * 3) // 4))


@functools.lru_cache(maxsize=1)
def _bf16_compute_ok() -> bool:
    # v6e / v7x VPU + EUP are bf16-capable; v5e and older are not.
    try:
        kind = jax.devices()[0].device_kind.lower()
    except Exception:
        kind = ""
    return ("v6" in kind) or ("v7" in kind)


def _compute_dtype(dtype):
    dtype = jnp.dtype(dtype)
    if dtype == jnp.bfloat16 and _bf16_compute_ok():
        return jnp.bfloat16
    return jnp.float32


def _choose_row_tile(rows: int, sub: int, rows_budget: int) -> int:
    """Row tile that is either the full row extent or a multiple of `sub`,
    capped by the VMEM budget and split so the grid has >= 2 parallel steps
    (v7x megacore) whenever possible."""
    if rows <= sub:
        return rows
    max_rows = max(sub, (rows_budget // sub) * sub)
    tile = min(rows, max_rows)
    tile = min(tile, _round_up(_cdiv(rows, 2), sub))   # aim for >= 2 grid steps
    if tile >= rows:
        return rows
    return max(sub, (tile // sub) * sub)


# ---------------------------------------------------------------------------
# Kernel bodies
# ---------------------------------------------------------------------------
def _elementwise_kernel(x_ref, o_ref, *, activacion: str, compute_dtype):
    x = x_ref[...]
    if activacion == "relu":
        y = jnp.maximum(x, jnp.zeros((), dtype=x.dtype))
    else:
        xf = x.astype(compute_dtype)
        if activacion == "tanh":
            y = jnp.tanh(xf)
        elif activacion == "sigmoid":
            y = jax.nn.sigmoid(xf)
        elif activacion == "softplus":
            # numerically-stable softplus: max(x, 0) + log1p(exp(-|x|))
            y = jnp.maximum(xf, 0.0) + jnp.log1p(jnp.exp(-jnp.abs(xf)))
        else:
            # 'sin' and the torch-style fallback for unknown names.
            y = jnp.sin(xf)
    o_ref[...] = y.astype(o_ref.dtype)


def _softmax_kernel(x_ref, o_ref):
    # Softmax over the last dim; the whole reduction axis is block-resident,
    # so this is exact.  Exact divide (not approx reciprocal): the kernel is
    # HBM-bound, so the extra VALU/EUP work is hidden under DMA.
    x = x_ref[...].astype(jnp.float32)
    m = jnp.max(x, axis=-1, keepdims=True)
    e = jnp.exp(x - m)
    denom = jnp.sum(e, axis=-1, keepdims=True)
    o_ref[...] = (e / denom).astype(o_ref.dtype)


# ---------------------------------------------------------------------------
# Wrappers
# ---------------------------------------------------------------------------
def _elementwise_pallas(x: jax.Array, activacion: str) -> jax.Array:
    orig_shape = x.shape
    dtype = x.dtype
    n = x.size
    if n == 0:
        return x
    itemsize = jnp.dtype(dtype).itemsize
    sub = _sublane_multiple(dtype)
    block_bytes = _max_block_bytes()

    # 2D lane-dense view.  The first two paths are free reshapes (no data
    # movement); only the truly-ragged path pays a pad + final slice.
    needs_slice = False
    if x.ndim >= 1 and orig_shape[-1] % 128 == 0:
        cols = orig_shape[-1]
        rows = n // cols
        x2 = x.reshape(rows, cols)
    elif n % _LANES == 0:
        cols = _LANES
        rows = n // cols
        x2 = x.reshape(rows, cols)
    else:
        padded_n = _round_up(n, _LANES)
        cols = _LANES
        rows = padded_n // cols
        x2 = jnp.pad(x.reshape(-1), (0, padded_n - n)).reshape(rows, cols)
        needs_slice = True

    # Column tile: keep the whole row if a sublane-deep slab fits the budget;
    # otherwise tile columns in multiples of 128 (only for very wide rows).
    if cols * itemsize * sub <= block_bytes:
        tile_cols = cols
    else:
        tile_cols = max(128, (block_bytes // (sub * itemsize)) // 128 * 128)
    rows_budget = max(sub, block_bytes // (tile_cols * itemsize))
    tile_rows = _choose_row_tile(rows, sub, rows_budget)

    grid = (_cdiv(rows, tile_rows), _cdiv(cols, tile_cols))
    kernel = functools.partial(
        _elementwise_kernel,
        activacion=activacion,
        compute_dtype=_compute_dtype(dtype),
    )

    out2 = pl.pallas_call(
        kernel,
        out_shape=jax.ShapeDtypeStruct((rows, cols), dtype),
        grid=grid,
        in_specs=[pl.BlockSpec((tile_rows, tile_cols), lambda i, j: (i, j))],
        out_specs=pl.BlockSpec((tile_rows, tile_cols), lambda i, j: (i, j)),
        compiler_params=pltpu.CompilerParams(
            dimension_semantics=("parallel", "parallel"),
            vmem_limit_bytes=_vmem_limit_bytes(),
        ),
    )(x2)

    if needs_slice:
        return out2.reshape(-1)[:n].reshape(orig_shape)
    return out2.reshape(orig_shape)


def _softmax_pallas(x: jax.Array) -> jax.Array:
    orig_shape = x.shape
    dtype = x.dtype
    if x.size == 0:
        return x
    itemsize = jnp.dtype(dtype).itemsize
    w = orig_shape[-1]
    rows = x.size // w
    sub = _sublane_multiple(dtype)
    block_bytes = _max_block_bytes()

    # Large-W guard: one minimal (sub, W) block, double-buffered in+out, plus
    # the in-kernel f32 temporaries, must fit comfortably in VMEM.
    min_block_bytes = sub * w * (itemsize + 4)
    needed = 4 * min_block_bytes
    cap = _vmem_capacity_bytes()
    if needed > cap - 8 * _MIB:
        # TODO(synk): W-tiled two-pass / online softmax for extremely wide rows.
        return jax.nn.softmax(x, axis=-1)
    vmem_limit = min(cap - 8 * _MIB, max(_vmem_limit_bytes(), needed))

    x2 = x.reshape(rows, w)
    rows_budget = max(sub, block_bytes // max(w * itemsize, 1))
    tile_rows = _choose_row_tile(rows, sub, rows_budget)
    grid = (_cdiv(rows, tile_rows),)

    out2 = pl.pallas_call(
        _softmax_kernel,
        out_shape=jax.ShapeDtypeStruct((rows, w), dtype),
        grid=grid,
        in_specs=[pl.BlockSpec((tile_rows, w), lambda i: (i, 0))],
        out_specs=pl.BlockSpec((tile_rows, w), lambda i: (i, 0)),
        compiler_params=pltpu.CompilerParams(
            dimension_semantics=("parallel",),
            vmem_limit_bytes=vmem_limit,
        ),
    )(x2)

    return out2.reshape(orig_shape)


@functools.partial(jax.jit, static_argnames=("activacion",))
def fun_act(x: jax.Array, activacion: str = "sin") -> jax.Array:
    """Pallas TPU implementation of FunAct.forward."""
    if activacion == "softmax":
        return _softmax_pallas(x)
    return _elementwise_pallas(x, activacion)


if __name__ == "__main__":
    key = jax.random.PRNGKey(0)
    # Small NCHW-like input consistent with a conv-style pipeline.
    x = jax.random.normal(key, (2, 4, 16, 16), dtype=jnp.float32)

    # Default activation of the module is 'sin'.
    out = jax.block_until_ready(fun_act(x))
    assert out.shape == x.shape and out.dtype == x.dtype
    assert jnp.allclose(out, jnp.sin(x), atol=1e-6)

    checks = {
        "relu": (jax.nn.relu(x), 1e-6),
        "tanh": (jnp.tanh(x), 1e-6),
        "sigmoid": (jax.nn.sigmoid(x), 1e-6),
        "softplus": (jax.nn.softplus(x), 1e-5),
        "softmax": (jax.nn.softmax(x, axis=-1), 1e-6),
    }
    for name, (ref, tol) in checks.items():
        got = jax.block_until_ready(fun_act(x, activacion=name))
        assert got.shape == ref.shape and got.dtype == x.dtype, name
        assert jnp.allclose(got, ref, atol=tol), name

    # Unknown activation falls back to sin (torch dict.get default).
    got = jax.block_until_ready(fun_act(x, activacion="not_a_real_act"))
    assert jnp.allclose(got, jnp.sin(x), atol=1e-6)

    # Exercise the other wrapper paths: a truly ragged shape (pad path) and a
    # 128-multiple last dim (free-reshape fast path with a masked boundary block).
    x_ragged = jax.random.normal(jax.random.PRNGKey(1), (3, 7, 5), dtype=jnp.float32)
    got = jax.block_until_ready(fun_act(x_ragged, activacion="tanh"))
    assert jnp.allclose(got, jnp.tanh(x_ragged), atol=1e-6)

    x_wide = jax.random.normal(jax.random.PRNGKey(2), (2, 9, 256), dtype=jnp.float32)
    got = jax.block_until_ready(fun_act(x_wide, activacion="sigmoid"))
    assert jnp.allclose(got, jax.nn.sigmoid(x_wide), atol=1e-6)
    got = jax.block_until_ready(fun_act(x_wide, activacion="softmax"))
    assert jnp.allclose(got, jax.nn.softmax(x_wide, axis=-1), atol=1e-6)

    print("KERNEL_OK")
</pallas_src>

<mosaic_0001>
module attributes {stable_mosaic.version = 11 : i64} {
  func.func @_elementwise_kernel(%arg0: i32, %arg1: i32, %arg2: memref<4x512xf32, #tpu.memory_space<vmem>>, %arg3: memref<4x512xf32, #tpu.memory_space<vmem>>) attributes {dimension_semantics = [#tpu.dimension_semantics<parallel>, #tpu.dimension_semantics<parallel>], iteration_bounds = array<i64: 1, 1>, scalar_prefetch = 0 : i64, scratch_operands = 0 : i64, tpu.core_type = #tpu.core_type<tc>, window_params = [{transform_indices = @transform_0, window_bounds = array<i64: 4, 512>}, {transform_indices = @transform_1, window_bounds = array<i64: 4, 512>}]} {
    %c0 = arith.constant 0 : index
    %c0_0 = arith.constant 0 : index
    %0 = vector.load %arg2[%c0, %c0_0] : memref<4x512xf32, #tpu.memory_space<vmem>>, vector<4x512xf32>
    %1 = math.sin %0 : vector<4x512xf32>
    %c0_1 = arith.constant 0 : index
    %c0_2 = arith.constant 0 : index
    %2 = vector.load %arg3[%c0_1, %c0_2] : memref<4x512xf32, #tpu.memory_space<vmem>>, vector<4x512xf32>
    tpu.vector_store %arg3[%c0_1, %c0_2], %1 {strides = array<i32>} : memref<4x512xf32, #tpu.memory_space<vmem>>, vector<4x512xf32>,
    return
  }
  func.func @transform_0(%arg0: i32, %arg1: i32) -> (i32, i32) {
    %c0_i32 = arith.constant 0 : i32
    return %arg0, %arg1 : i32, i32
  }
  func.func @transform_1(%arg0: i32, %arg1: i32) -> (i32, i32) {
    %c0_i32 = arith.constant 0 : i32
    return %arg0, %arg1 : i32, i32
  }
}

</mosaic_0001>

<bundles_post_ra>
// kernel: fun_act.1
= control target key start
LH: loop header
LB: loop body
LE: loop exit
PB: predicated region body
PF: predicated region fallthrough
CT: control target
= control target key end

     0   :  { %v254_v24 = vmov 683565275   ;;  %v255_v26 = vmov 2475754826   ;;  %v256_v28 = vmov 2131351028   ;;  %s352_s0 = inlined_call_operand.vmem [shape: f32[4,512], index: 0, kind: input, shape index: {}]   ;;  %s353_s1 = inlined_call_operand.vmem [shape: f32[4,512], index: 1, kind: output, shape index: {}]  }
   0x1   :  { %v273_v0 = vld [vmem:[%s352_s0] sm:$0xff]  ;;  %v278_v1 = vld [vmem:[%s352_s0 + $0x8] sm:$0xff]  ;;  %v257_v30 = vmov 2102212464   ;;  %v258_v32 = vmov 920167782  }
   0x2   :  { %v10_v2 = vand.u32 2147483647, %v273_v0  ;;  %v13_v3 = vand.u32 2139095040, %v273_v0  ;;  %v114_v4 = vand.u32 2147483647, %v278_v1  ;;  %v117_v5 = vand.u32 2139095040, %v278_v1 }
   0x3   :  { %v259_v40 = vmov 1326507024   ;;  %vm12_vm14 = vcmp.lt.s32.totalorder %v273_v0, 0 }
   0x4   :  { %v14_v6 = vshrl.u32 %v13_v3, 23  ;;  %v17_v7 = vand.u32 8388607, %v10_v2  ;;  %v118_v8 = vshrl.u32 %v117_v5, 23  ;;  %v121_v9 = vand.u32 8388607, %v114_v4 }
   0x5   :  { %vm11_vm15 = vcmp.le.f32.partialorder %v10_v2, 0.7853982 }
   0x6   :  { %v224_v10 = vadd.s32 4294967169, %v14_v6  ;;  %v228_v11 = vadd.s32 4294967169, %v118_v8  ;;  %v18_v13 = vor.u32 8388608, %v17_v7  ;;  %v122_v14 = vor.u32 8388608, %v121_v9 }
   0x8   :  { %v20_v12 = vadd.s32 1, %v224_v10  ;;  %v124_v15 = vadd.s32 1, %v228_v11  ;;  %v288_v20 = vshll.u32 %v18_v13, 8  ;;  %v290_v22 = vshll.u32 %v122_v14, 8 }
   0xa   :  { %vm21_vm0 = vcmp.gt.s32.totalorder %v20_v12, 0  ;;  %vm125_vm1 = vcmp.gt.s32.totalorder %v124_v15, 0 }
   0xb   :  { %v22_v16 = vsel %vm21_vm0, %v20_v12, 0  ;;  %v126_v19 = vsel %vm125_vm1, %v124_v15, 0  ;;  %vm116_vm0 = vcmp.lt.s32.totalorder %v278_v1, 0  ;;  %vm115_vm1 = vcmp.le.f32.partialorder %v114_v4, 0.7853982 }
   0xc   :  { %v23_v17 = vshrl.u32 %v22_v16, 5  ;;  %v24_v18 = vand.u32 31, %v22_v16  ;;  %v128_v21 = vand.u32 31, %v126_v19  ;;  %v292_v34 = vshrl.u32 %v126_v19, 5 }
   0xe   :  { %v25_v23 = vsub.s32 32, %v24_v18  ;;  %v27_v25 = vshll.u32 %v254_v24, %v24_v18  ;;  %v30_v27 = vshll.u32 %v255_v26, %v24_v18  ;;  %v33_v29 = vshll.u32 %v256_v28, %v24_v18 }
   0xf   :  { %v36_v31 = vshll.u32 %v257_v30, %v24_v18  ;;  %v39_v33 = vshll.u32 %v258_v32, %v24_v18  ;;  %vm42_vm2 = vcmp.lt.s32.totalorder %v23_v17, 1  ;;  %vm43_vm3 = vcmp.lt.s32.totalorder %v23_v17, 2 }
  0x10   :  { %v26_v35 = vshrl.u32 %v254_v24, %v25_v23  ;;  %v28_v36 = vshrl.u32 %v255_v26, %v25_v23  ;;  %v31_v37 = vshrl.u32 %v256_v28, %v25_v23  ;;  %v34_v38 = vshrl.u32 %v257_v30, %v25_v23 }
  0x11   :  { %v37_v39 = vshrl.u32 %v258_v32, %v25_v23  ;;  %v40_v41 = vshrl.u32 %v259_v40, %v25_v23  ;;  %vm45_vm4 = vcmp.lt.s32.totalorder %v23_v17, 4  ;;  %v129_v45 = vsub.s32 32, %v128_v21 }
  0x12   :  { %v29_v42 = vor.u32 %v28_v36, %v27_v25  ;;  %v32_v43 = vor.u32 %v31_v37, %v30_v27  ;;  %v35_v44 = vor.u32 %v34_v38, %v33_v29  ;;  %vm44_vm5 = vcmp.lt.s32.totalorder %v23_v17, 3 }
  0x13   :  { %v38_v46 = vor.u32 %v37_v39, %v36_v31  ;;  %v41_v47 = vor.u32 %v40_v41, %v39_v33  ;;  %v131_v48 = vshll.u32 %v254_v24, %v128_v21  ;;  %v134_v56 = vshll.u32 %v255_v26, %v128_v21 }
  0x14   :  { %v46_v49 = vsel %vm42_vm2, %v26_v35, %v29_v42  ;;  %v47_v50 = vsel %vm45_vm4, %v35_v44, 2102212464  ;;  %v50_v51 = vsel %vm42_vm2, %v29_v42, %v32_v43  ;;  %v54_v52 = vsel %vm42_vm2, %v32_v43, %v35_v44 }
  0x15   :  { %v48_v53 = vsel %vm44_vm5, %v32_v43, %v47_v50  ;;  %v51_v54 = vsel %vm45_vm4, %v38_v46, 920167782  ;;  %v55_v55 = vsel %vm45_vm4, %v41_v47, 1326507024  ;;  %v130_v59 = vshrl.u32 %v254_v24, %v129_v45 }
  0x16   :  { %v52_v57 = vsel %vm44_vm5, %v35_v44, %v51_v54  ;;  %v56_v58 = vsel %vm44_vm5, %v38_v46, %v55_v55  ;;  %v132_v60 = vshrl.u32 %v255_v26, %v129_v45  ;;  %v49_v61 = vsel %vm43_vm3, %v46_v49, %v48_v53 }
  0x17   :  { %v53_v62 = vsel %vm43_vm3, %v50_v51, %v52_v57  ;;  %v57_v63 = vsel %vm43_vm3, %v54_v52, %v56_v58  ;;  %v135_v3 = vshrl.u32 %v256_v28, %v129_v45  ;;  %v137_v11 = vshll.u32 %v256_v28, %v128_v21 }
  0x18   :  { %v301_v5 = vmul.u32.u64.low %v288_v20, %v57_v63  ;;  %v302_v6 = vmul.u32.u64.high %v288_v20, %v57_v63, %v301_v5  ;;  %v305_v7 = vmul.u32.u64.low %v288_v20, %v53_v62  ;;  %v306_v8 = vmul.u32.u64.high %v288_v20, %v53_v62, %v305_v7 }
  0x19   :  { %v133_v9 = vor.u32 %v132_v60, %v131_v48  ;;  %v136_v10 = vor.u32 %v135_v3, %v134_v56  ;;  %v138_v12 = vshrl.u32 %v257_v30, %v129_v45  ;;  %v140_v13 = vshll.u32 %v257_v30, %v128_v21 }
  0x1a   :  { %v141_v14 = vshrl.u32 %v258_v32, %v129_v45  ;;  %v143_v15 = vshll.u32 %v258_v32, %v128_v21  ;;  %v144_v16 = vshrl.u32 %v259_v40, %v129_v45  ;;  %v65_v17 = vmul.u32 %v288_v20, %v49_v61 }
  0x1b   :  { %v139_v18 = vor.u32 %v138_v12, %v137_v11  ;;  %vm146_vm6 = vcmp.lt.s32.totalorder %v292_v34, 1  ;;  %vm147_vm7 = vcmp.lt.s32.totalorder %v292_v34, 2  ;;  %vm67_vm8 = vc.u32 %v302_v6, %v305_v7 }
  0x1c   :  { %v68_v19 = vadd.s32 1, %v306_v8  ;;  %v142_v23 = vor.u32 %v141_v14, %v140_v13  ;;  %vm148_vm9 = vcmp.lt.s32.totalorder %v292_v34, 3  ;;  %v145_v24 = vor.u32 %v144_v16, %v143_v15 }
  0x1d   :  { %vm149_vm10 = vcmp.lt.s32.totalorder %v292_v34, 4  ;;  %v150_v25 = vsel %vm146_vm6, %v130_v59, %v133_v9  ;;  %v154_v21 = vsel %vm146_vm6, %v133_v9, %v136_v10  ;;  %v158_v28 = vsel %vm146_vm6, %v136_v10, %v139_v18 }
  0x1e   :  { %v69_v26 = vsel %vm67_vm8, %v68_v19, %v306_v8  ;;  %v151_v20 = vsel %vm149_vm10, %v139_v18, 2102212464  ;;  %v155_v27 = vsel %vm149_vm10, %v142_v23, 920167782  ;;  %v159_v32 = vsel %vm149_vm10, %v145_v24, 1326507024 }
  0x1f   :  { %v70_v29 = vadd.s32 %v69_v26, %v65_v17  ;;  %v152_v30 = vsel %vm148_vm9, %v136_v10, %v151_v20  ;;  %v156_v31 = vsel %vm148_vm9, %v139_v18, %v155_v27  ;;  %v160_v36 = vsel %vm148_vm9, %v142_v23, %v159_v32 }
  0x20   :  { %v153_v33 = vsel %vm147_vm7, %v150_v25, %v152_v30  ;;  %v157_v35 = vsel %vm147_vm7, %v154_v21, %v156_v31  ;;  %v161_v38 = vsel %vm147_vm7, %v158_v28, %v160_v36  ;;  %v66_v57 = vadd.s32 %v305_v7, %v302_v6 }
  0x21   :  { %v71_v37 = vadd.s32 536870912, %v70_v29  ;;  %v323_v39 = vmul.u32.u64.low %v290_v22, %v157_v35  ;;  %v324_v40 = vmul.u32.u64.high %v290_v22, %v157_v35, %v323_v39  ;;  %v169_v44 = vmul.u32 %v290_v22, %v153_v33 }
  0x22   :  { %v327_v41 = vmul.u32.u64.low %v290_v22, %v161_v38  ;;  %v328_v42 = vmul.u32.u64.high %v290_v22, %v161_v38, %v327_v41  ;;  %vm102_vm5 = vweird.f32 %v273_v0  ;;  %vm206_vm9 = vweird.f32 %v278_v1 }
  0x23   :  { %v72_v43 = vshrl.u32 %v71_v37, 30  ;;  %v172_v46 = vadd.s32 1, %v324_v40 }
  0x24   :  { %vm171_vm11 = vc.u32 %v328_v42, %v323_v39  ;;  %v170_v13 = vadd.s32 %v323_v39, %v328_v42 }
  0x25   :  { %v73_v45 = vshll.u32 %v72_v43, 30  ;;  %v173_v34 = vsel %vm171_vm11, %v172_v46, %v324_v40  ;;  %v96_v6 = vsub.s32 4, %v72_v43 }
  0x26   :  { %v174_v48 = vadd.s32 %v173_v34, %v169_v44 }
  0x27   :  { %v74_v47 = vsub.s32 %v70_v29, %v73_v45  ;;  %v97_v25 = vsel %vm12_vm14, %v96_v6, %v72_v43 }
  0x28   :  { %v175_v50 = vadd.s32 536870912, %v174_v48  ;;  %v99_v28 = vsel %vm11_vm15, 0, %v97_v25 }
  0x29   :  { %v76_v49 = vsub.s32 0, %v74_v47  ;;  %v103_v33 = vadd.s32 3, %v99_v28 }
  0x2a   :  { %v176_v52 = vshrl.u32 %v175_v50, 30 }
  0x2b   :  { %v225_v51 = vmin.u32 %v76_v49, %v74_v47  ;;  %v104_v37 = vand.u32 3, %v103_v33 }
  0x2c   :  { %v177_v54 = vshll.u32 %v176_v52, 30  ;;  %v200_v32 = vsub.s32 4, %v176_v52 }
  0x2d   :  { %v78_v53 = vclz %v225_v51  ;;  %vm109_vm2 = vcmp.eq.s32.totalorder %v104_v37, 2  ;;  %vm106_vm3 = vcmp.eq.s32.totalorder %v104_v37, 0  ;;  %vm105_vm4 = vcmp.lt.s32.totalorder %v104_v37, 2 }
  0x2e   :  { %v178_v56 = vsub.s32 %v174_v48, %v177_v54  ;;  %v201_v36 = vsel %vm116_vm0, %v200_v32, %v176_v52 }
  0x2f   :  { %v226_v55 = vadd.s32 4294967294, %v78_v53  ;;  %v203_v40 = vsel %vm115_vm1, 0, %v201_v36 }
  0x30   :  { %v180_v58 = vsub.s32 0, %v178_v56  ;;  %v207_v44 = vadd.s32 3, %v203_v40 }
  0x31   :  { %vm227_vm12 = vcmp.lt.s32.totalorder %v226_v55, 0 }
  0x32   :  { %v81_v22 = vsel %vm227_vm12, 0, %v226_v55  ;;  %v229_v62 = vmin.u32 %v180_v58, %v178_v56  ;;  %v208_v34 = vand.u32 3, %v207_v44 }
  0x33   :  { %v82_v59 = vsub.s32 32, %v81_v22  ;;  %v83_v60 = vshll.u32 %v74_v47, %v81_v22  ;;  %v86_v61 = vsub.s32 4294967266, %v81_v22 }
  0x34   :  { %v182_v5 = vclz %v229_v62  ;;  %vm213_vm6 = vcmp.eq.s32.totalorder %v208_v34, 2  ;;  %vm210_vm7 = vcmp.eq.s32.totalorder %v208_v34, 0  ;;  %vm209_vm8 = vcmp.lt.s32.totalorder %v208_v34, 2 }
  0x35   :  { %v84_v63 = vshrl.u32 %v66_v57, %v82_v59  ;;  %v87_v3 = vadd.s32 127, %v86_v61 }
  0x36   :  { %v230_v10 = vadd.s32 4294967294, %v182_v5 }
  0x37   :  { %v85_v8 = vor.u32 %v84_v63, %v83_v60  ;;  %v88_v9 = vshll.u32 %v87_v3, 23 }
  0x38   :  { %vm231_vm13 = vcmp.lt.s32.totalorder %v230_v10, 0 }
  0x39   :  { %v89_v11 = vor.u32 4788187, %v88_v9  ;;  %v92_v12 = vcvt.s32.f32 %v85_v8  ;;  %v185_v7 = vsel %vm231_vm13, 0, %v230_v10 }
  0x3a   :  { %v186_v15 = vsub.s32 32, %v185_v7  ;;  %v187_v16 = vshll.u32 %v178_v56, %v185_v7  ;;  %v190_v17 = vsub.s32 4294967266, %v185_v7 }
  0x3b   :  { %v90_v14 = vand.u32 2147483647, %v89_v11 }
  0x3c   :  { %v188_v19 = vshrl.u32 %v170_v13, %v186_v15  ;;  %v191_v23 = vadd.s32 127, %v190_v17 }
  0x3d   :  { %v93_v18 = vmul.f32 %v92_v12, %v90_v14 }
  0x3e   :  { %v189_v21 = vor.u32 %v188_v19, %v187_v16  ;;  %v192_v26 = vshll.u32 %v191_v23, 23 }
  0x3f   :  { %v94_v24 = vxor.u32 2147483648, %v93_v18 }
  0x40   :  { %v193_v29 = vor.u32 4788187, %v192_v26  ;;  %v196_v30 = vcvt.s32.f32 %v189_v21 }
  0x41   :  { %v95_v20 = vsel %vm12_vm14, %v94_v24, %v93_v18 }
  0x42   :  { %v98_v27 = vsel %vm11_vm15, %v273_v0, %v95_v20  ;;  %v194_v31 = vand.u32 2147483647, %v193_v29 }
  0x43   :  { %246 = vcosq.f32 %v98_v27 }
  0x44   :  { %248 = vsinq.f32 %v98_v27  ;;  %v197_v35 = vmul.f32 %v196_v30, %v194_v31 }
  0x46   :  { %v198_v2 = vxor.u32 2147483648, %v197_v35 }
  0x48   :  { %v199_v38 = vsel %vm116_vm0, %v198_v2, %v197_v35 }
  0x49   :  { %v202_v39 = vsel %vm115_vm1, %v278_v1, %v199_v38 }
  0x4a   :  { %250 = vcosq.f32 %v202_v39 }
  0x4b   :  { %252 = vsinq.f32 %v202_v39 }
  0x4d   :  { %v247_v41 = vpop.eup %246 }
  0x4e   :  { %v249_v42 = vpop.eup %248  ;;  %v110_v43 = vxor.u32 2147483648, %v247_v41 }
  0x4f   :  { %v107_v45 = vxor.u32 2147483648, %v249_v42 }
  0x50   :  { %v111_v4 = vsel %vm109_vm2, %v110_v43, %v249_v42 }
  0x51   :  { %v108_v46 = vsel %vm106_vm3, %v247_v41, %v107_v45 }
  0x52   :  { %v112_v47 = vsel %vm105_vm4, %v108_v46, %v111_v4 }
  0x53   :  { %v113_v48 = vsel %vm102_vm5, nan, %v112_v47 }
  0x54   :  { %218 = vst [vmem:[%s353_s1] sm:$0xff] %v113_v48  ;;  %v251_v49 = vpop.eup %250 }
  0x55   :  { %v253_v50 = vpop.eup %252  ;;  %v214_v51 = vxor.u32 2147483648, %v251_v49 }
  0x56   :  { %v211_v52 = vxor.u32 2147483648, %v253_v50 }
  0x57   :  { %v215_v53 = vsel %vm213_vm6, %v214_v51, %v253_v50 }
  0x58   :  { %v212_v0 = vsel %vm210_vm7, %v251_v49, %v211_v52 }
  0x59   :  { %v216_v54 = vsel %vm209_vm8, %v212_v0, %v215_v53 }
  0x5a   :  { %v217_v55 = vsel %vm206_vm9, nan, %v216_v54 }
  0x5b   :  { %219 = vst [vmem:[%s353_s1 + $0x8] sm:$0xff] %v217_v55 }

</bundles_post_ra>
